<compile_context>
chip_gen: v5e
topology: v5e:2x2
jax: 0.10.0
libtpu: 0.0.40
codegen_flags: <defaults>
</compile_context>

<pallas_src>
import functools
import math

import jax
import jax.numpy as jnp
from jax.experimental import pallas as pl
from jax.experimental.pallas import tpu as pltpu


# ----------------------------------------------------------------------------
# rotary embedding table (matches the usual compute_cos_sin_emb)
# ----------------------------------------------------------------------------
def compute_cos_sin_emb(dim, seq_len, base=10000.0):
    inv_freq = 1.0 / (base ** (jnp.arange(0, dim, 2, dtype=jnp.float32) / dim))
    t = jnp.arange(seq_len, dtype=jnp.float32)
    freqs = jnp.outer(t, inv_freq)                      # (seq_len, dim/2)
    emb = jnp.concatenate([freqs, freqs], axis=-1)      # (seq_len, dim)
    return jnp.cos(emb), jnp.sin(emb)


# ----------------------------------------------------------------------------
# ConvTokenizer: Conv1d(C_in -> E, k=3, stride=1, pad=1, bias).
# Three accumulated matmuls on the (per-sequence) padded input; no widened
# input materialized in HBM.  Output blocks are lane-dense (T, E=128).
# ----------------------------------------------------------------------------
def conv_tokenizer_kernel(x_ref, w_ref, b_ref, o_ref):
    t = o_ref.shape[1]
    bf16 = jnp.bfloat16
    x0 = x_ref[0, 0:t, :].astype(bf16)          # tap t-1
    x1 = x_ref[0, 1:t + 1, :].astype(bf16)      # tap t
    x2 = x_ref[0, 2:t + 2, :].astype(bf16)      # tap t+1
    y = (jnp.dot(x0, w_ref[0], preferred_element_type=jnp.float32)
         + jnp.dot(x1, w_ref[1], preferred_element_type=jnp.float32)
         + jnp.dot(x2, w_ref[2], preferred_element_type=jnp.float32)
         + b_ref[...])
    o_ref[0] = y


def conv_tokenizer(x, weight, bias):
    """x: (B, A, T, C_in); weight: torch Conv1d layout (E, C_in, 3); bias: (E,)."""
    b, a, t, cin = x.shape
    e = weight.shape[0]
    n = b * a
    xp = jnp.pad(x.reshape(n, t, cin).astype(jnp.float32),
                 ((0, 0), (1, 1), (0, 0)))                    # (n, t+2, cin)
    wk = jnp.transpose(weight, (2, 1, 0)).astype(jnp.bfloat16)  # (3, cin, e)

    out = pl.pallas_call(
        conv_tokenizer_kernel,
        out_shape=jax.ShapeDtypeStruct((n, t, e), jnp.float32),
        grid_spec=pltpu.PrefetchScalarGridSpec(
            num_scalar_prefetch=0,
            grid=(n,),
            in_specs=[
                pl.BlockSpec((1, t + 2, cin), lambda i: (i, 0, 0)),
                pl.BlockSpec((3, cin, e), lambda i: (0, 0, 0)),
                pl.BlockSpec((1, e), lambda i: (0, 0)),
            ],
            out_specs=pl.BlockSpec((1, t, e), lambda i: (i, 0, 0)),
        ),
        compiler_params=pltpu.CompilerParams(dimension_semantics=("parallel",)),
    )(xp, wk, bias.reshape(1, e).astype(jnp.float32))
    return out.reshape(b, a, t, e)


# ----------------------------------------------------------------------------
# SpaNet kernel: grid = (num_layers,).  One layer's weights are streamed into
# VMEM per grid step (auto double-buffered, overlapping the next layer's weight
# DMA with this layer's compute); the activation (B*S, D) is carried across the
# layer axis in an f32 VMEM scratch.  Output (lane-dense (B*S, 128)) is written
# only at the last layer, after the final RMSNorm.
# ----------------------------------------------------------------------------
def spanet_kernel(x_ref, cos_ref, sin_ref, mask_ref, n1_ref, n2_ref,
                  wqkv_ref, wo_ref, w1_ref, w2_ref, nf_ref,
                  o_ref, x_scr, *, num_heads, eps):
    layer = pl.program_id(0)
    num_layers = pl.num_programs(0)
    rows, d = x_scr.shape
    hd = d // num_heads
    scale = 1.0 / math.sqrt(hd)
    bf16 = jnp.bfloat16

    @pl.when(layer == 0)
    def _():
        x_scr[...] = x_ref[...]                 # load residual stream (f32)

    cos = cos_ref[...]                          # (rows, d) f32, batch-tiled
    sin_s = sin_ref[...]                        # sign-folded sin, (rows, d) f32
    bmask = mask_ref[...]                       # (rows, rows): 0 in-batch, -1e30 cross

    def rmsnorm(t, w):                          # t: (rows, d) f32, w: (1, d)
        ms = jnp.mean(t * t, axis=-1, keepdims=True)
        return t * jax.lax.rsqrt(ms + eps) * w

    def rope(t):                                # rotate-half via XLU roll
        return t * cos + pltpu.roll(t, shift=d // 2, axis=1) * sin_s

    x = x_scr[...]

    # --- attention block (pre-norm) ---
    h = rmsnorm(x, n1_ref[0])
    qkv = jnp.dot(h.astype(bf16), wqkv_ref[0],
                  preferred_element_type=jnp.float32)          # (rows, 3d)
    q = rope(qkv[:, :d]).astype(bf16)                          # (rows, d)
    k_t = rope(qkv[:, d:2 * d]).T.astype(bf16)                 # (d, rows), one transpose
    v = qkv[:, 2 * d:].astype(bf16)                            # (rows, d)

    # Per-head 2-D MXU matmuls over all B*S rows at once; the additive
    # block-diagonal mask removes cross-batch attention.
    # TODO(synk): for large B the cross-batch score FLOPs wasted here grow
    # linearly; tile the attention per batch block in that regime.
    outs = []
    for hh in range(num_heads):
        sl = slice(hh * hd, (hh + 1) * hd)
        sc = jnp.dot(q[:, sl], k_t[sl, :],
                     preferred_element_type=jnp.float32) * scale + bmask
        sc = sc - jnp.max(sc, axis=-1, keepdims=True)
        p = jnp.exp(sc)
        p = p * pl.reciprocal(jnp.sum(p, axis=-1, keepdims=True), approx=True)
        outs.append(jnp.dot(p.astype(bf16), v[:, sl],
                            preferred_element_type=jnp.float32))
    attn = jnp.concatenate(outs, axis=-1)                      # (rows, d)
    x = x + jnp.dot(attn.astype(bf16), wo_ref[0],
                    preferred_element_type=jnp.float32)

    # --- feed-forward block (pre-norm) ---
    h2 = rmsnorm(x, n2_ref[0])
    ff = jnp.dot(h2.astype(bf16), w1_ref[0], preferred_element_type=jnp.float32)
    ff = jax.nn.gelu(ff, approximate=False)     # exact erf (torch nn.GELU default)
    x = x + jnp.dot(ff.astype(bf16), w2_ref[0],
                    preferred_element_type=jnp.float32)

    x_scr[...] = x

    @pl.when(layer == num_layers - 1)
    def _():
        o_ref[...] = rmsnorm(x, nf_ref[...]).astype(o_ref.dtype)


def spanet_forward(map_feat, params, *, agent_feat=None, num_heads, eps=1e-5):
    if agent_feat is not None:
        x = jnp.concatenate([agent_feat, map_feat], axis=1)
    else:
        x = map_feat
    b, s, d = x.shape
    rows = b * s
    num_layers = params["wq"].shape[0]
    ffn = params["w1"].shape[2]
    bf16 = jnp.bfloat16

    cos = params["cos"][:s].astype(jnp.float32)
    sin = params["sin"][:s].astype(jnp.float32)
    # sign-folded sin table: rotate-half(x)*sin == roll(x, D/2) * sin_signed
    sin_signed = jnp.concatenate([-sin[:, :d // 2], sin[:, d // 2:]], axis=-1)
    cos_t = jnp.tile(cos, (b, 1))               # (rows, d)
    sin_t = jnp.tile(sin_signed, (b, 1))        # (rows, d)

    # Additive batch-block-diagonal mask (folding B into the attention rows).
    row_b = jnp.repeat(jnp.arange(b), s)
    bmask = jnp.where(row_b[:, None] == row_b[None, :], 0.0, -1e30)
    bmask = bmask.astype(jnp.float32)           # (rows, rows)

    # fused QKV weight: (L, D, 3D)
    wqkv = jnp.concatenate([params["wq"], params["wk"], params["wv"]],
                           axis=-1).astype(bf16)
    wo = params["wo"].astype(bf16)
    w1 = params["w1"].astype(bf16)
    w2 = params["w2"].astype(bf16)
    n1 = params["n1"].reshape(num_layers, 1, d).astype(jnp.float32)
    n2 = params["n2"].reshape(num_layers, 1, d).astype(jnp.float32)
    nf = params["nf"].astype(jnp.float32)

    kernel = functools.partial(spanet_kernel, num_heads=num_heads, eps=eps)

    # VMEM per step ~= 2 x 384 KB of double-buffered bf16 weights + ~100 KB of
    # grid-invariant activations/tables at the test sizes: well under the
    # 16/32 MiB scoped defaults on all generations.
    # TODO(synk): if D/FFN grow (e.g. D=1024, FFN=4096), tile W1/W2 along the
    # FFN axis with an extra reduction grid axis and/or set vmem_limit_bytes;
    # optionally raise weight pipelining via pipeline_mode=pl.Buffered(3).
    out = pl.pallas_call(
        kernel,
        out_shape=jax.ShapeDtypeStruct((rows, d), jnp.float32),
        grid_spec=pltpu.PrefetchScalarGridSpec(
            num_scalar_prefetch=0,
            grid=(num_layers,),
            in_specs=[
                pl.BlockSpec((rows, d), lambda l: (0, 0)),        # x (rows, D)
                pl.BlockSpec((rows, d), lambda l: (0, 0)),        # cos (tiled)
                pl.BlockSpec((rows, d), lambda l: (0, 0)),        # sin (folded, tiled)
                pl.BlockSpec((rows, rows), lambda l: (0, 0)),     # batch mask
                pl.BlockSpec((1, 1, d), lambda l: (l, 0, 0)),     # norm1[l]
                pl.BlockSpec((1, 1, d), lambda l: (l, 0, 0)),     # norm2[l]
                pl.BlockSpec((1, d, 3 * d), lambda l: (l, 0, 0)), # Wqkv[l]
                pl.BlockSpec((1, d, d), lambda l: (l, 0, 0)),     # Wo[l]
                pl.BlockSpec((1, d, ffn), lambda l: (l, 0, 0)),   # W1[l]
                pl.BlockSpec((1, ffn, d), lambda l: (l, 0, 0)),   # W2[l]
                pl.BlockSpec((1, d), lambda l: (0, 0)),           # final norm
            ],
            out_specs=pl.BlockSpec((rows, d), lambda l: (0, 0)),
            scratch_shapes=[pltpu.VMEM((rows, d), jnp.float32)],  # x carry
        ),
        compiler_params=pltpu.CompilerParams(
            dimension_semantics=("arbitrary",)),   # sequential layer carry
    )(x.reshape(rows, d).astype(jnp.float32), cos_t, sin_t, bmask,
      n1, n2, wqkv, wo, w1, w2, nf)
    return out.reshape(b, s, d)


# ----------------------------------------------------------------------------
# pure-JAX references (same bf16 matmul-operand precision, for correctness)
# ----------------------------------------------------------------------------
def spanet_ref(x, params, num_heads, eps=1e-5):
    d = x.shape[-1]
    s = x.shape[1]
    hd = d // num_heads
    bf16 = jnp.bfloat16
    cos = params["cos"][:s]
    sin = params["sin"][:s]

    def rmsnorm(t, w):
        return t * jax.lax.rsqrt(jnp.mean(t * t, -1, keepdims=True) + eps) * w

    def rope(t):
        t1, t2 = t[..., : d // 2], t[..., d // 2:]
        return t * cos + jnp.concatenate([-t2, t1], -1) * sin

    def mm(a_, b_):
        return jnp.dot(a_.astype(bf16), b_.astype(bf16),
                       preferred_element_type=jnp.float32)

    num_layers = params["wq"].shape[0]
    for i in range(num_layers):
        bsz = x.shape[0]
        h = rmsnorm(x, params["n1"][i])
        q = rope(mm(h, params["wq"][i]))
        k = rope(mm(h, params["wk"][i]))
        v = mm(h, params["wv"][i])
        qh = q.reshape(bsz, s, num_heads, hd).transpose(0, 2, 1, 3).astype(bf16)
        kh = k.reshape(bsz, s, num_heads, hd).transpose(0, 2, 1, 3).astype(bf16)
        vh = v.reshape(bsz, s, num_heads, hd).transpose(0, 2, 1, 3).astype(bf16)
        sc = jnp.einsum("bhqd,bhkd->bhqk", qh, kh,
                        preferred_element_type=jnp.float32) / math.sqrt(hd)
        p = jax.nn.softmax(sc, -1)
        o = jnp.einsum("bhqk,bhkd->bhqd", p.astype(bf16), vh,
                       preferred_element_type=jnp.float32)
        o = o.transpose(0, 2, 1, 3).reshape(bsz, s, d)
        x = x + mm(o, params["wo"][i])
        h2 = rmsnorm(x, params["n2"][i])
        x = x + mm(jax.nn.gelu(mm(h2, params["w1"][i]), approximate=False),
                   params["w2"][i])
    return rmsnorm(x, params["nf"][0])


def conv_tokenizer_ref(x, weight, bias):
    b, a, t, c = x.shape
    bf16 = jnp.bfloat16
    xf = x.reshape(b * a, t, c)
    xp = jnp.pad(xf, ((0, 0), (1, 1), (0, 0))).astype(bf16)
    wk = jnp.transpose(weight, (2, 1, 0)).astype(bf16)

    def mm(a_, b_):
        return jnp.einsum("ntc,ce->nte", a_, b_,
                          preferred_element_type=jnp.float32)

    y = (mm(xp[:, 0:t], wk[0]) + mm(xp[:, 1:t + 1], wk[1])
         + mm(xp[:, 2:t + 2], wk[2]) + bias)
    return y.reshape(b, a, t, -1)


# ----------------------------------------------------------------------------
# deterministic parameter init
# ----------------------------------------------------------------------------
def init_params(key, num_layers, dim, ffn_dim, seq_len):
    ks = jax.random.split(key, 6)
    s_d = 1.0 / math.sqrt(dim)
    s_f = 1.0 / math.sqrt(ffn_dim)
    cos, sin = compute_cos_sin_emb(dim, seq_len)
    return {
        "n1": jnp.ones((num_layers, dim), jnp.float32),
        "n2": jnp.ones((num_layers, dim), jnp.float32),
        "nf": jnp.ones((1, dim), jnp.float32),
        "wq": jax.random.normal(ks[0], (num_layers, dim, dim), jnp.float32) * s_d,
        "wk": jax.random.normal(ks[1], (num_layers, dim, dim), jnp.float32) * s_d,
        "wv": jax.random.normal(ks[2], (num_layers, dim, dim), jnp.float32) * s_d,
        "wo": jax.random.normal(ks[3], (num_layers, dim, dim), jnp.float32) * s_d,
        "w1": jax.random.normal(ks[4], (num_layers, dim, ffn_dim), jnp.float32) * s_d,
        "w2": jax.random.normal(ks[5], (num_layers, ffn_dim, dim), jnp.float32) * s_f,
        "cos": cos,
        "sin": sin,
    }


if __name__ == "__main__":
    # module defaults: lane_dim=2, num_layers=3, num_heads=8, dim=128, seq_len=20
    B, A, T, LANE = 2, 3, 8, 2
    DIM, HEADS, LAYERS, SEQ = 128, 8, 3, 20
    FFN = 4 * DIM
    EPS = 1e-5

    key = jax.random.PRNGKey(0)
    k_par, k_cw, k_cb, k_lane, k_map, k_agent = jax.random.split(key, 6)
    params = init_params(k_par, LAYERS, DIM, FFN, SEQ)

    # --- ConvTokenizer submodule (not invoked by SpaNet.forward, as in PyTorch) ---
    conv_w = jax.random.normal(k_cw, (DIM, LANE, 3), jnp.float32) / math.sqrt(LANE * 3)
    conv_b = jax.random.normal(k_cb, (DIM,), jnp.float32) * 0.01
    lane_feat = jax.random.normal(k_lane, (B, A, T, LANE), jnp.float32)
    tok = jax.block_until_ready(conv_tokenizer(lane_feat, conv_w, conv_b))
    tok_ref = conv_tokenizer_ref(lane_feat, conv_w, conv_b)
    assert tok.shape == (B, A, T, DIM)
    assert float(jnp.max(jnp.abs(tok - tok_ref))) < 2e-2

    # --- SpaNet.forward: concat(agent, map) -> L RoPE attn layers -> RMSNorm ---
    map_feat = jax.random.normal(k_map, (B, 16, DIM), jnp.float32)
    agent_feat = jax.random.normal(k_agent, (B, 4, DIM), jnp.float32)
    out = spanet_forward(map_feat, params, agent_feat=agent_feat,
                         num_heads=HEADS, eps=EPS)
    out = jax.block_until_ready(out)

    x_full = jnp.concatenate([agent_feat, map_feat], axis=1)
    ref = spanet_ref(x_full, params, HEADS, EPS)
    assert out.shape == (B, SEQ, DIM)
    assert float(jnp.max(jnp.abs(out - ref))) < 5e-2

    print("KERNEL_OK")
</pallas_src>

<mosaic_0001>
module attributes {stable_mosaic.version = 11 : i64} {
  func.func @conv_tokenizer_kernel(%arg0: i32, %arg1: memref<1x10x2xf32, #tpu.memory_space<vmem>>, %arg2: memref<3x2x128xbf16, #tpu.memory_space<vmem>>, %arg3: memref<1x128xf32, #tpu.memory_space<vmem>>, %arg4: memref<1x8x128xf32, #tpu.memory_space<vmem>>) attributes {dimension_semantics = [#tpu.dimension_semantics<parallel>], iteration_bounds = array<i64: 6>, scalar_prefetch = 0 : i64, scratch_operands = 0 : i64, tpu.core_type = #tpu.core_type<tc>, window_params = [{transform_indices = @transform_0, window_bounds = array<i64: 1, 10, 2>}, {pipeline_mode = #tpu.pipeline_mode<synchronous>, transform_indices = @transform_1, window_bounds = array<i64: 3, 2, 128>}, {pipeline_mode = #tpu.pipeline_mode<synchronous>, transform_indices = @transform_2, window_bounds = array<i64: 1, 128>}, {transform_indices = @transform_3, window_bounds = array<i64: 1, 8, 128>}]} {
    %c0 = arith.constant 0 : index
    %c0_0 = arith.constant 0 : index
    %c0_1 = arith.constant 0 : index
    %0 = vector.load %arg1[%c0, %c0_0, %c0_1] : memref<1x10x2xf32, #tpu.memory_space<vmem>>, vector<1x8x2xf32>
    %1 = vector.shape_cast %0 : vector<1x8x2xf32> to vector<8x2xf32>
    %2 = arith.truncf %1 : vector<8x2xf32> to vector<8x2xbf16>
    %c0_2 = arith.constant 0 : index
    %c1 = arith.constant 1 : index
    %c0_3 = arith.constant 0 : index
    %3 = vector.load %arg1[%c0_2, %c1, %c0_3] : memref<1x10x2xf32, #tpu.memory_space<vmem>>, vector<1x8x2xf32>
    %4 = vector.shape_cast %3 : vector<1x8x2xf32> to vector<8x2xf32>
    %5 = arith.truncf %4 : vector<8x2xf32> to vector<8x2xbf16>
    %c0_4 = arith.constant 0 : index
    %c2 = arith.constant 2 : index
    %c0_5 = arith.constant 0 : index
    %6 = vector.load %arg1[%c0_4, %c2, %c0_5] : memref<1x10x2xf32, #tpu.memory_space<vmem>>, vector<1x8x2xf32>
    %7 = vector.shape_cast %6 : vector<1x8x2xf32> to vector<8x2xf32>
    %8 = arith.truncf %7 : vector<8x2xf32> to vector<8x2xbf16>
    %c0_6 = arith.constant 0 : index
    %c0_7 = arith.constant 0 : index
    %c0_8 = arith.constant 0 : index
    %9 = vector.load %arg2[%c0_6, %c0_7, %c0_8] : memref<3x2x128xbf16, #tpu.memory_space<vmem>>, vector<1x2x128xbf16>
    %10 = vector.shape_cast %9 : vector<1x2x128xbf16> to vector<2x128xbf16>
    %cst = arith.constant dense<0.000000e+00> : vector<8x128xf32>
    %11 = tpu.matmul %2, %10, %cst {dimension_numbers = #tpu.dot_dimension_numbers<[1], [0], [0], [1], [0, 0, 1, 1], [], []>} : vector<8x2xbf16>, vector<2x128xbf16>, vector<8x128xf32> -> vector<8x128xf32>
    %c1_9 = arith.constant 1 : index
    %c0_10 = arith.constant 0 : index
    %c0_11 = arith.constant 0 : index
    %12 = vector.load %arg2[%c1_9, %c0_10, %c0_11] : memref<3x2x128xbf16, #tpu.memory_space<vmem>>, vector<1x2x128xbf16>
    %13 = vector.shape_cast %12 : vector<1x2x128xbf16> to vector<2x128xbf16>
    %cst_12 = arith.constant dense<0.000000e+00> : vector<8x128xf32>
    %14 = tpu.matmul %5, %13, %cst_12 {dimension_numbers = #tpu.dot_dimension_numbers<[1], [0], [0], [1], [0, 0, 1, 1], [], []>} : vector<8x2xbf16>, vector<2x128xbf16>, vector<8x128xf32> -> vector<8x128xf32>
    %15 = arith.addf %11, %14 : vector<8x128xf32>
    %c2_13 = arith.constant 2 : index
    %c0_14 = arith.constant 0 : index
    %c0_15 = arith.constant 0 : index
    %16 = vector.load %arg2[%c2_13, %c0_14, %c0_15] : memref<3x2x128xbf16, #tpu.memory_space<vmem>>, vector<1x2x128xbf16>
    %17 = vector.shape_cast %16 : vector<1x2x128xbf16> to vector<2x128xbf16>
    %cst_16 = arith.constant dense<0.000000e+00> : vector<8x128xf32>
    %18 = tpu.matmul %8, %17, %cst_16 {dimension_numbers = #tpu.dot_dimension_numbers<[1], [0], [0], [1], [0, 0, 1, 1], [], []>} : vector<8x2xbf16>, vector<2x128xbf16>, vector<8x128xf32> -> vector<8x128xf32>
    %19 = arith.addf %15, %18 : vector<8x128xf32>
    %c0_17 = arith.constant 0 : index
    %c0_18 = arith.constant 0 : index
    %20 = vector.load %arg3[%c0_17, %c0_18] : memref<1x128xf32, #tpu.memory_space<vmem>>, vector<1x128xf32>
    %21 = vector.broadcast %20 : vector<1x128xf32> to vector<8x128xf32>
    %22 = arith.addf %19, %21 : vector<8x128xf32>
    %c0_19 = arith.constant 0 : index
    %c0_20 = arith.constant 0 : index
    %c0_21 = arith.constant 0 : index
    %23 = vector.load %arg4[%c0_19, %c0_20, %c0_21] : memref<1x8x128xf32, #tpu.memory_space<vmem>>, vector<1x8x128xf32>
    %24 = vector.shape_cast %23 : vector<1x8x128xf32> to vector<8x128xf32>
    %25 = vector.shape_cast %22 : vector<8x128xf32> to vector<1x8x128xf32>
    tpu.vector_store %arg4[%c0_19, %c0_20, %c0_21], %25 {strides = array<i32>} : memref<1x8x128xf32, #tpu.memory_space<vmem>>, vector<1x8x128xf32>,
    return
  }
  func.func @transform_0(%arg0: i32) -> (i32, i32, i32) {
    %c0_i32 = arith.constant 0 : i32
    %c0_i32_0 = arith.constant 0 : i32
    %c0_i32_1 = arith.constant 0 : i32
    return %arg0, %c0_i32, %c0_i32_0 : i32, i32, i32
  }
  func.func @transform_1(%arg0: i32) -> (i32, i32, i32) {
    %c0_i32 = arith.constant 0 : i32
    %c0_i32_0 = arith.constant 0 : i32
    %c0_i32_1 = arith.constant 0 : i32
    %c0_i32_2 = arith.constant 0 : i32
    return %c0_i32, %c0_i32_0, %c0_i32_1 : i32, i32, i32
  }
  func.func @transform_2(%arg0: i32) -> (i32, i32) {
    %c0_i32 = arith.constant 0 : i32
    %c0_i32_0 = arith.constant 0 : i32
    %c0_i32_1 = arith.constant 0 : i32
    return %c0_i32, %c0_i32_0 : i32, i32
  }
  func.func @transform_3(%arg0: i32) -> (i32, i32, i32) {
    %c0_i32 = arith.constant 0 : i32
    %c0_i32_0 = arith.constant 0 : i32
    %c0_i32_1 = arith.constant 0 : i32
    return %arg0, %c0_i32, %c0_i32_0 : i32, i32, i32
  }
}

</mosaic_0001>

<bundles_post_ra>
// kernel: tpu_custom_call.1
= control target key start
LH: loop header
LB: loop body
LE: loop exit
PB: predicated region body
PF: predicated region fallthrough
CT: control target
= control target key end

     0   :  { %8 = vsyncpa [#allocation3], 0  ;;  %s560_s0 = inlined_call_operand.vmem [shape: f32[6,10,2], index: 0, kind: input, shape index: {}]   ;;  %s561_s1 = inlined_call_operand.vmem [shape: bf16[3,2,128], index: 1, kind: input, shape index: {}]   ;;  %s562_s2 = inlined_call_operand.vmem [shape: f32[1,128], index: 2, kind: input, shape index: {}]   ;;  %s563_s3 = inlined_call_operand.hbm [shape: f32[6,8,128], index: 3, kind: output, shape index: {}]  }
   0x1   :  { %10 = vsyncpa [#allocation3 + $0x1], 0  ;;  %s463_s12 = smov 0   ;;  %s465_s13 = smov 0  }
   0x2   :  { %s467_s14 = smov 0   ;;  %s469_s15 = smov 0  }
   0x3 LB: > { %s484_s16 = sadd.s32 4294967295, %s441_s15   ;;  %s322_s17 = sadd.s32 4294967294, %s441_s15   ;;  %s441_s15 = sphi %s469_s15, %s569_s15   ;;  %s437_s14 = sphi %s467_s14, %s568_s14   ;;  %s433_s13 = sphi %s465_s13, %s567_s13   ;;  %s429_s12 = sphi %s463_s12, %s566_s12  }
   0x4   : > { %s488_s18 = sadd.s32 1, %s441_s15   ;;  %s91_s19 = sadd.s32 1, %s437_s14 }
   0x5   : > { %s88_s20 = ssub.s32 %s441_s15, %s488_s18  ;;  %p101_p0 = scmp.ne.s32.totalorder %s437_s14, %s433_s13 }
   0x6   : > { %p89_p1 = scmp.eq.s32.totalorder %s88_s20, 0  ;;  %p102_p2 = scmp.eq.s32.totalorder %s484_s16, 5 }
   0x7   : > { %p107_p3 = scmp.ne.s32.totalorder %s433_s13, %s429_s12  ;;  %p108_p4 = scmp.eq.s32.totalorder %s322_s17, 5 }
   0x8   : > { %s499_s21 = scalar_select %p89_p1, %s437_s14, %s91_s19  }
   0x9   : > { %p501_p5 = por %p102_p2, %p101_p0  ;;  %p505_p6 = por %p108_p4, %p107_p3 }
   0xa   : > { %p325_p7 = scmp.ge.s32.totalorder %s441_s15, 1  ;;  %p140_p8 = scmp.lt.s32.totalorder %s441_s15, 7 }
   0xc   : > { %p141_p9 = pnand %p325_p7, %p140_p8 }
   0xd   : > { %p164_p10 = scmp.lt.s32.totalorder (!%p141_p9), %s484_s16, 5  ;;  %s161_s8 = sand.u32 (!%p141_p9), 1, %s433_s13  }
   0xe   : > { %144 = sbr.rel (%p141_p9) target bundleno = 168 (0xa8), region = 32  ;;  %s326_s9 = sshll.u32 (!%p141_p9), %s161_s8, 3 }
   0xf   : > { %s335_s10 = sshll.u32 (!%p141_p9), %s484_s16, 3  ;;  %s163_s25 = scalar_lea.vmem (!%p141_p9), [#allocation2], %s326_s9 }
  0x10   : > { %s258_s19 = scalar_lea.hbm (!%p141_p9), %s563_s3, %s335_s10  ;;  %s260_s26 = sshll.u32 (!%p141_p9), %s163_s25, 4  ;;  %s261_s26 = int_to_ptr.vmem [resolvable:$true] %s260_s26 }
  0x11   : > { %s262_s27 = sshll.u32 (!%p141_p9), %s258_s19, 4  ;;  %s399_s5 = scalar_lea.hbm (!%p141_p9), %s563_s3, 48  ;;  %s263_s27 = int_to_ptr.hbm [resolvable:$true] %s262_s27 }
  0x12   : > { %s393_s28 = sshra.s32 (!%p141_p9), %s263_s27, 4  ;;  %s394_s28 = int_to_ptr.hbm [resolvable:$true] %s393_s28 }
  0x13   : > { %v329_v0 = vld [vmem:[%s561_s1 + $0x1] sm:$0x1]  ;;  %vm183_vm0 = vcmask 1040384   ;;  %v176_v1 = vld [vmem:[%s561_s1] sm:$0x1]  ;;  %s165_s30 = scalar_select %p164_p10, %s484_s16, 5 }
  0x14   : > { %v185_v2 = vsel %vm183_vm0, %v329_v0, 0  ;;  %v204_v3 = vsel %vm183_vm0, %v176_v1, 0  ;;  %v332_v4 = vld [vmem:[%s561_s1 + $0x2] sm:$0x1]  ;;  %vm179_vm1 = vcmask 15360   ;;  %s248_s16 = scalar_lea.sflag [#allocation3], %s161_s8  ;;  %p400_p0 = scmp.lt.s32.totalorder %s394_s28, %s563_s3 }
  0x15   : > { %194 = vmatpush.bf16.msra.mxu0 %v185_v2  ;;  %213 = vmatpush.bf16.msra.mxu1 %v204_v3  ;;  %v225_v5 = vsel %vm183_vm0, %v332_v4, 0  ;;  %s338_s4 = sshll.u32 %s165_s30, 4  ;;  %v378_v15 = vld [vmem:[%s562_s2] ss:$0 sm:$0xff]  ;;  %s395_s29 = scalar_lea.hbm %s394_s28, 8 }
  0x16   : > { %234 = vmatpush.bf16.msra.mxu2 %v225_v5  ;;  %s168_s7 = scalar_lea.vmem %s560_s0, %s338_s4  ;;  %p396_p11 = scmp.ne.s32.totalorder %s394_s28, %s395_s29 }
  0x17   : > { %v172_v6 = vld [vmem:[%s168_s7 + $0x1] sm:$0xff]  ;;  %p401_p1 = scmp.lt.s32.totalorder %s399_s5, %s395_s29 }
  0x18   : > { %v170_v7 = vld [vmem:[%s168_s7] sm:$0xff]  ;;  %v173_v9 = vpack.c.bf16 %v172_v6, %v172_v6  ;;  %p397_p12 = pnand %p396_p11, %p501_p5 }
  0x19   : > { %v174_v8 = vld [vmem:[%s168_s7 + $0x2] sm:$0xff]  ;;  %v171_v10 = vpack.c.bf16 %v170_v7, %v170_v7  ;;  %p402_p2 = por %p401_p1, %p400_p0 }
  0x1a   : > { %v175_v11 = vpack.c.bf16 %v174_v8, %v174_v8  ;;  %330 = vmatmul.msk.bf16.vlgmr.msra.gmra.mxu0 %vm179_vm1, %v173_v9  ;;  %p398_p13 = pneg %p397_p12 }
  0x1b   : > { %331 = vmatmul.msk.bf16.vlgmr.msra.gmra.mxu1 %vm179_vm1, %v171_v10 }
  0x1c   : > { %333 = vmatmul.msk.bf16.vlgmr.msra.gmra.mxu2 %vm179_vm1, %v175_v11  ;;  %p403_p3 = pnand %p402_p2, %p398_p13 }
  0x97   : > { %v196_v12 = vpop.f32.mrf.mxu0 }
  0x98   : > { %v215_v13 = vpop.f32.mrf.mxu1 }
  0x99   : > { %v216_v14 = vadd.f32 %v215_v13, %v196_v12 }
  0x9f   : > { %v236_v16 = vpop.f32.mrf.mxu2  ;;  %v198_v18 = vpop.f32.mrf.mxu0 }
  0xa0   : > { %v240_v17 = vadd.f32 %v236_v16, %v216_v14  ;;  %v217_v19 = vpop.f32.mrf.mxu1 }
  0xa2   : > { %v245_v20 = vadd.f32 %v378_v15, %v240_v17 }
  0xa4   : > { %246 = vst [vmem:[%s163_s25] sm:$0xff] %v245_v20 }
  0xa5   : > { %406 = shalt.err (!%p403_p3)
}
  0xa6   : > { %339 = dma.vmem_to_hbm [thread:$0]  (%p501_p5), %s261_s26, 128, %s263_s27, %s248_s16  }
  0xa7   : > { %v238_v21 = vpop.f32.mrf.mxu2 }
  0xa8 PF: > { %p345_p4 = scmp.ge.s32.totalorder %s441_s15, 2  ;;  %s274_s8 = sand.u32 1, %s429_s12  }
  0xa9   : > { %s275_s9 = scalar_lea.sflag [#allocation3], %s274_s8 }
  0xaa   : > { %p342_p7 = pnand %p345_p4, %p505_p6 }
  0xac   : > { %p343_p8 = pneg %p342_p7 }
  0xae   : > { %424 = dma.done.wait (%p343_p8), %s275_s9, 128  }
  0xaf   : > { %426 = vsyncadd (%p343_p8), %s275_s9, 4294967168  ;;  %p13_p9 = scmp.ge.s32.totalorder %s488_s18, 8   ;;  %s566_s12 = smov %s433_s13 }
  0xb0   : > { %s567_s13 = smov %s437_s14  ;;  %s568_s14 = smov %s499_s21 }
  0xb1   : > { %s569_s15 = smov %s488_s18  ;;  %15 = sbr.rel (!%p13_p9) target bundleno = 3 (0x3), region = 69 }
  0xb6   :  { %281 = vsyncpa [#allocation3], 1 }
  0xb7   :  { %283 = vsyncpa [#allocation3 + $0x1], 1 }

</bundles_post_ra>
